<compile_context>
chip_gen: v7x
topology: tpu7x:2x2x1
jax: 0.10.0
libtpu: 0.0.40
codegen_flags: <defaults>
</compile_context>

<pallas_src>
import functools
import math

import jax
import jax.numpy as jnp
from jax.experimental import pallas as pl
from jax.experimental.pallas import tpu as pltpu


# ---------------------------------------------------------------------------
# Parameter ("buffer") construction -- deterministic, mirrors nn.Module.__init__
# ---------------------------------------------------------------------------
def make_positional_encoding_table(max_len: int, d_model: int,
                                   dtype=jnp.float32) -> jax.Array:
    """pe[l, 2i]   = sin(l * exp(-2i * ln(10000)/d_model))
       pe[l, 2i+1] = cos(l * exp(-2i * ln(10000)/d_model))"""
    position = jnp.arange(max_len, dtype=jnp.float32)[:, None]          # (L, 1)
    div_term = jnp.exp(jnp.arange(0, d_model, 2, dtype=jnp.float32)
                       * (-math.log(10000.0) / d_model))                # (D/2,)
    angles = position * div_term                                        # (L, D/2)
    pe = jnp.zeros((max_len, d_model), jnp.float32)
    pe = pe.at[:, 0::2].set(jnp.sin(angles))
    pe = pe.at[:, 1::2].set(jnp.cos(angles))
    return pe.astype(dtype)


# ---------------------------------------------------------------------------
# Counter-based dropout mask (shared by kernel and reference check)
# ---------------------------------------------------------------------------
def _hash_u32(x):
    """lowbias32 integer mixer (uint32 in / uint32 out)."""
    x = x ^ (x >> 16)
    x = x * jnp.uint32(0x7FEB352D)
    x = x ^ (x >> 15)
    x = x * jnp.uint32(0x846CA68B)
    x = x ^ (x >> 16)
    return x


def _keep_mask(rows_u32, cols_u32, seed_u32, p):
    """Deterministic keep-mask: P(keep) ~= 1 - p, independent of tiling.

    rows_u32 / cols_u32 may be low-rank (e.g. (ts,1,D) and (1,B,D)); the
    per-axis multiplies then run at small shapes and only the xor + lowbias32
    pass is full-tile.  # TODO(synk): mask differs from torch's RNG stream.
    """
    row_key = rows_u32 * jnp.uint32(0x9E3779B1)
    col_key = (cols_u32 * jnp.uint32(0x85EBCA77)) ^ seed_u32
    k = row_key ^ col_key                                  # broadcast to full tile
    thresh = jnp.uint32(min(int(p * 4294967296.0), 4294967295))
    return _hash_u32(k) >= thresh


# ---------------------------------------------------------------------------
# Kernel: add positional encoding (broadcast over batch) + inverted dropout
# ---------------------------------------------------------------------------
def _pos_enc_kernel(seed_ref, x_ref, pe_ref, o_ref, *, p, apply_dropout,
                    compute_dtype):
    # x_ref/o_ref: (ts, B, D) tiles; pe_ref: (ts, 1, D) fp32 tile.
    pe_tile = pe_ref[...].astype(compute_dtype)              # small (ts,1,D) cast
    y = x_ref[...].astype(compute_dtype) + pe_tile           # broadcast over batch

    if apply_dropout:
        ts, b, d = y.shape
        row0 = pl.program_id(0) * ts                         # global seq offset
        rows = (jax.lax.broadcasted_iota(jnp.int32, (ts, 1, d), 0)
                + row0).astype(jnp.uint32)                   # (ts, 1, D)
        b_idx = jax.lax.broadcasted_iota(jnp.int32, (1, b, d), 1)
        d_idx = jax.lax.broadcasted_iota(jnp.int32, (1, b, d), 2)
        cols = (b_idx * d + d_idx).astype(jnp.uint32)        # (1, B, D) = b*D + d
        keep = _keep_mask(rows, cols, seed_ref[0].astype(jnp.uint32), p)
        scale = jnp.asarray(1.0 / (1.0 - p), compute_dtype)
        y = jnp.where(keep, y * scale, jnp.zeros_like(y))

    o_ref[...] = y.astype(o_ref.dtype)


# ---------------------------------------------------------------------------
# Wrapper
# ---------------------------------------------------------------------------
def _choose_seq_tile(S, row_bytes, target_bytes=4 * 1024 * 1024):
    """~4 MiB of x per tile; always >= 2 grid steps (S permitting) for v7x."""
    ts = max(8, (target_bytes // max(1, row_bytes)) // 8 * 8)
    if ts >= S:
        ts = max(1, -(-S // 2))         # ceil(S/2): keep >= 2 blocks for megacore
    return min(ts, S)


def positional_encoding(x, pe, *, dropout_p=0.1, train=True, seed=0,
                        seq_tile=None):
    """x: (S, B, D); pe: (max_len, D) fp32 table with max_len >= S."""
    S, B, D = x.shape
    assert pe.shape[0] >= S and pe.shape[-1] == D

    # pe streamed un-expanded in fp32; kernel broadcasts over the batch axis.
    pe3d = pe[:S].astype(jnp.float32).reshape(S, 1, D)

    itemsize = jnp.dtype(x.dtype).itemsize
    if seq_tile is None:
        ts = _choose_seq_tile(S, B * D * itemsize)
    else:
        ts = min(int(seq_tile), S)
        assert ts > 0, "seq_tile must be positive"

    # bf16 VALU path on v6e/v7x; fp32 everywhere else (incl. v5e).
    compute_dtype = jnp.bfloat16 if x.dtype == jnp.bfloat16 else jnp.float32

    kernel = functools.partial(
        _pos_enc_kernel,
        p=float(dropout_p),
        apply_dropout=bool(train) and float(dropout_p) > 0.0,
        compute_dtype=compute_dtype)
    seed_arr = jnp.array([seed], dtype=jnp.int32)

    out = pl.pallas_call(
        kernel,
        out_shape=jax.ShapeDtypeStruct((S, B, D), x.dtype),
        grid_spec=pltpu.PrefetchScalarGridSpec(
            num_scalar_prefetch=1,                           # seed -> SMEM
            grid=(pl.cdiv(S, ts),),                          # ragged last tile OK
            in_specs=[
                pl.BlockSpec((ts, B, D), lambda i, seed: (i, 0, 0)),   # x
                pl.BlockSpec((ts, 1, D), lambda i, seed: (i, 0, 0)),   # pe (fp32)
            ],
            out_specs=pl.BlockSpec((ts, B, D), lambda i, seed: (i, 0, 0)),
        ),
        compiler_params=pltpu.CompilerParams(
            dimension_semantics=("parallel",),               # megacore on v7x
            vmem_limit_bytes=32 * 1024 * 1024,               # safe on v5e/v6e/v7x
        ),
    )(seed_arr, x, pe3d)

    return out


# ---------------------------------------------------------------------------
# Demo / self-check
# ---------------------------------------------------------------------------
if __name__ == "__main__":
    d_model = 32
    max_len = 64
    seq_len = 8
    batch = 2
    dropout_p = 0.1

    key = jax.random.PRNGKey(0)
    x = jax.random.normal(key, (seq_len, batch, d_model), dtype=jnp.float32)
    pe = make_positional_encoding_table(max_len, d_model)

    ref = x + pe[:seq_len][:, None, :]

    # --- eval mode (dropout disabled): exact check against pure-JAX reference
    y_eval = jax.block_until_ready(
        positional_encoding(x, pe, dropout_p=dropout_p, train=False))
    assert y_eval.shape == (seq_len, batch, d_model)
    assert jnp.allclose(y_eval, ref, atol=1e-6, rtol=1e-6), "eval-mode mismatch"

    # --- train mode (inverted dropout, deterministic counter-based mask)
    seed = 1234
    y_train = jax.block_until_ready(
        positional_encoding(x, pe, dropout_p=dropout_p, train=True, seed=seed))
    assert y_train.shape == (seq_len, batch, d_model)

    # Exact reference: replicate the keep-mask outside the kernel (mask depends
    # only on global (row, b*D+d, seed), never on tiling).
    S, B, D = x.shape
    rows = jnp.arange(S, dtype=jnp.uint32)[:, None, None]                 # (S,1,1)
    cols = (jnp.arange(B, dtype=jnp.uint32)[None, :, None] * jnp.uint32(D)
            + jnp.arange(D, dtype=jnp.uint32)[None, None, :])             # (1,B,D)
    keep = _keep_mask(rows, cols, jnp.uint32(seed), dropout_p)
    expected = jnp.where(keep, ref * (1.0 / (1.0 - dropout_p)), 0.0)
    assert jnp.allclose(y_train, expected, atol=1e-5, rtol=1e-5), \
        "train-mode mismatch"

    print("KERNEL_OK")
</pallas_src>

<mosaic_0001>
module attributes {stable_mosaic.version = 11 : i64} {
  func.func @_pos_enc_kernel(%arg0: i32, %arg1: memref<1xi32, #tpu.memory_space<smem>>, %arg2: memref<4x2x32xf32, #tpu.memory_space<vmem>>, %arg3: memref<4x1x32xf32, #tpu.memory_space<vmem>>, %arg4: memref<4x2x32xf32, #tpu.memory_space<vmem>>) attributes {dimension_semantics = [#tpu.dimension_semantics<parallel>], iteration_bounds = array<i64: 2>, scalar_prefetch = 1 : i64, scratch_operands = 0 : i64, tpu.core_type = #tpu.core_type<tc>, window_params = [{transform_indices = @transform_0, window_bounds = array<i64: 4, 2, 32>}, {transform_indices = @transform_1, window_bounds = array<i64: 4, 1, 32>}, {transform_indices = @transform_2, window_bounds = array<i64: 4, 2, 32>}]} {
    %c0 = arith.constant 0 : index
    %c0_0 = arith.constant 0 : index
    %c0_1 = arith.constant 0 : index
    %0 = vector.load %arg3[%c0, %c0_0, %c0_1] : memref<4x1x32xf32, #tpu.memory_space<vmem>>, vector<4x1x32xf32>
    %c0_2 = arith.constant 0 : index
    %c0_3 = arith.constant 0 : index
    %c0_4 = arith.constant 0 : index
    %1 = vector.load %arg2[%c0_2, %c0_3, %c0_4] : memref<4x2x32xf32, #tpu.memory_space<vmem>>, vector<4x2x32xf32>
    %2 = vector.broadcast %0 : vector<4x1x32xf32> to vector<4x2x32xf32>
    %3 = arith.addf %1, %2 : vector<4x2x32xf32>
    %c0_5 = arith.constant 0 : index
    %c0_6 = arith.constant 0 : index
    %c0_7 = arith.constant 0 : index
    %4 = vector.load %arg4[%c0_5, %c0_6, %c0_7] : memref<4x2x32xf32, #tpu.memory_space<vmem>>, vector<4x2x32xf32>
    tpu.vector_store %arg4[%c0_5, %c0_6, %c0_7], %3 {strides = array<i32>} : memref<4x2x32xf32, #tpu.memory_space<vmem>>, vector<4x2x32xf32>,
    return
  }
  func.func @transform_0(%arg0: i32, %arg1: memref<1xi32, #tpu.memory_space<smem>>) -> (i32, i32, i32) {
    %c0_i32 = arith.constant 0 : i32
    %c0_i32_0 = arith.constant 0 : i32
    %c0_i32_1 = arith.constant 0 : i32
    return %arg0, %c0_i32, %c0_i32_0 : i32, i32, i32
  }
  func.func @transform_1(%arg0: i32, %arg1: memref<1xi32, #tpu.memory_space<smem>>) -> (i32, i32, i32) {
    %c0_i32 = arith.constant 0 : i32
    %c0_i32_0 = arith.constant 0 : i32
    %c0_i32_1 = arith.constant 0 : i32
    return %arg0, %c0_i32, %c0_i32_0 : i32, i32, i32
  }
  func.func @transform_2(%arg0: i32, %arg1: memref<1xi32, #tpu.memory_space<smem>>) -> (i32, i32, i32) {
    %c0_i32 = arith.constant 0 : i32
    %c0_i32_0 = arith.constant 0 : i32
    %c0_i32_1 = arith.constant 0 : i32
    return %arg0, %c0_i32, %c0_i32_0 : i32, i32, i32
  }
}

</mosaic_0001>

<bundles_post_ra>
// kernel: tpu_custom_call.1
= control target key start
LH: loop header
LB: loop body
LE: loop exit
PB: predicated region body
PF: predicated region fallthrough
CT: control target
= control target key end

     0   :  { %9 = vsyncpa [#allocation5], 0  ;;  %s817_s0 = inlined_call_operand.<no memory space> [shape: s32[1], index: 0, kind: input, shape index: {}]   ;;  %s818_s1 = inlined_call_operand.hbm [shape: f32[8,2,32], index: 1, kind: input, shape index: {}]   ;;  %s819_s2 = inlined_call_operand.hbm [shape: f32[8,1,32], index: 2, kind: input, shape index: {}]   ;;  %s820_s3 = inlined_call_operand.hbm [shape: f32[8,2,32], index: 3, kind: output, shape index: {}]  }
   0x1   :  { %11 = vsyncpa [#allocation5 + $0x1], 0 }
   0x2   :  { %12 = vsyncpa [#allocation8], 0 }
   0x3   :  { %14 = vsyncpa [#allocation8 + $0x1], 0 }
   0x4   :  { %15 = vsyncpa [#allocation6], 0 }
   0x5   :  { %17 = vsyncpa [#allocation6 + $0x1], 0  ;;  %s601_s12 = smov 0   ;;  %s603_s13 = smov 0  }
   0x6   :  { %s605_s0 = smov 0   ;;  %s607_s14 = smov 0  }
   0x7 LB: > { %s622_s15 = sadd.s32 4294967295, %s570_s14   ;;  %s358_s16 = sadd.s32 4294967294, %s570_s14   ;;  %s570_s14 = sphi %s607_s14, %s836_s14   ;;  %s566_s0 = sphi %s605_s0, %s835_s0   ;;  %s562_s13 = sphi %s603_s13, %s834_s13   ;;  %s558_s12 = sphi %s601_s12, %s833_s12  }
   0x8   : > { %s626_s17 = sadd.s32 1, %s570_s14   ;;  %s30_s18 = sadd.s32 1, %s566_s0 }
   0x9   : > { %s27_s19 = ssub.s32 %s570_s14, %s626_s17  ;;  %p37_p0 = scmp.ne.s32.totalorder %s566_s0, %s562_s13 }
   0xa   : > { %p28_p1 = scmp.eq.s32.totalorder %s27_s19, 0  ;;  %p38_p2 = scmp.eq.s32.totalorder %s570_s14, 0 }
   0xb   : > { %p43_p3 = scmp.ne.s32.totalorder %s562_s13, %s558_s12  ;;  %p44_p4 = scmp.eq.s32.totalorder %s622_s15, 0 }
   0xc   : > { %s638_s20 = scalar_select %p28_p1, %s566_s0, %s30_s18  }
   0xd   : > { %p640_p5 = por %p38_p2, %p37_p0  ;;  %p644_p6 = por %p44_p4, %p43_p3 }
   0xe   : > { %p93_p7 = scmp.eq.s32.totalorder %s622_s15, 1  ;;  %p99_p8 = scmp.eq.s32.totalorder %s358_s16, 1 }
   0xf   : > { %s824_s22 = scalar_select %p644_p6, 1, 0 }
  0x10   : > { %p400_p10 = scmp.lt.s32.totalorder %s570_s14, 2  ;;  %p651_p11 = por %p93_p7, %p37_p0 }
  0x11   : > { %p655_p12 = por %p99_p8, %p43_p3  ;;  %s660_s25 = sand.u32 1, %s566_s0  }
  0x12   : > { %s825_s23 = scalar_select %p651_p11, 1, 0 }
  0x13   : > { %s826_s24 = scalar_select %p655_p12, 1, 0 }
  0x14   : > { %s380_s26 = sshll.u32 %s570_s14, 7  ;;  %s361_s27 = sshll.u32 %s660_s25, 3 }
  0x15   : > { %s667_s30 = scalar_lea.hbm %s818_s1, %s380_s26  ;;  %s123_s4 = scalar_lea.vmem [#allocation4], %s361_s27 }
  0x16   : > { %s130_s5 = sshll.u32 %s123_s4, 4  ;;  %p671_p13 = pnand %p400_p10, %p640_p5  ;;  %s675_s5 = int_to_ptr.vmem [resolvable:$true] %s130_s5 }
  0x17   : > { %s120_s7 = scalar_lea.sflag [#allocation5], %s660_s25  ;;  %s440_s8 = scalar_lea.hbm %s667_s30, 128 }
  0x18   : > { %p441_p0 = scmp.ne.s32.totalorder %s667_s30, %s440_s8  ;;  %p442_p1 = pneg %p671_p13 }
  0x19   : > { %s445_s11 = scalar_lea.hbm %s818_s1, 256  ;;  %p446_p4 = scmp.lt.u32.totalorder %s667_s30, %s818_s1 }
  0x1a   : > { %p443_p2 = pnand %p442_p1, %p441_p0  ;;  %p447_p5 = scmp.lt.u32.totalorder %s445_s11, %s440_s8 }
  0x1b   : > { %p449_p8 = scmp.lt.u32.totalorder %s440_s8, %s667_s30 }
  0x1c   : > { %p444_p3 = pneg %p443_p2  ;;  %p448_p7 = por %p447_p5, %p446_p4 }
  0x1e   : > { %p450_p10 = por %p449_p8, %p448_p7 }
  0x20   : > { %p451_p9 = pnand %p450_p10, %p444_p3 }
  0x22   : > { %454 = shalt.err (!%p451_p9)
}
  0x23   : > { %s455_s19 = scalar_lea.vmem %s675_s5, 128  ;;  %s572_s21 = smov [#allocation4]  }
  0x24   : > { %p456_p0 = scmp.ne.s32.totalorder %s675_s5, %s455_s19  ;;  %s460_s26 = sshll.u32 %s572_s21, 4  ;;  %s461_s26 = int_to_ptr.vmem [resolvable:$false] %s460_s26 }
  0x25   : > { %s462_s27 = scalar_lea.vmem %s461_s26, 256  ;;  %p463_p11 = scmp.lt.s32.totalorder %s675_s5, %s461_s26 }
  0x26   : > { %p458_p2 = pnand %p456_p0, %p442_p1  ;;  %p464_p4 = scmp.lt.s32.totalorder %s462_s27, %s455_s19 }
  0x28   : > { %p459_p12 = pneg %p458_p2  ;;  %p465_p5 = por %p464_p4, %p463_p11 }
  0x2a   : > { %p466_p7 = pnand %p465_p5, %p459_p12 }
  0x2c   : > { %469 = shalt.err (!%p466_p7)
}
  0x2d   : > { %s573_s28 = smov 32   ;;  %s574_s29 = smov 2  }
  0x2e   : > { %392 = dma.hbm_to_vmem [thread:$0]  (!%p671_p13), %s667_s30, 128, %s675_s5, %s120_s7, %s573_s28, %s573_s28, %s574_s29  }
  0x2f   : > { %p367_p9 = scmp.ge.s32.totalorder %s570_s14, 1  ;;  %p159_p3 = scmp.lt.s32.totalorder %s570_s14, 3 }
  0x30   : > { %s364_s4 = sshll.u32 %s660_s25, 2  ;;  %s381_s9 = sshll.u32 %s570_s14, 6 }
  0x31   : > { %p708_p11 = pnand %p367_p9, %p159_p3  ;;  %s144_s10 = scalar_lea.vmem [#allocation7], %s364_s4 }
  0x32   : > { %s151_s11 = sshll.u32 %s144_s10, 4  ;;  %s716_s19 = scalar_lea.hbm %s819_s2, %s381_s9  ;;  %s718_s11 = int_to_ptr.vmem [resolvable:$true] %s151_s11 }
  0x33   : > { %s141_s30 = scalar_lea.sflag [#allocation8], %s660_s25  ;;  %s470_s5 = scalar_lea.hbm %s716_s19, 64 }
  0x34   : > { %p471_p12 = scmp.ne.s32.totalorder %s716_s19, %s470_s5  ;;  %s475_s26 = scalar_lea.hbm %s819_s2, 128 }
  0x35   : > { %p476_p0 = scmp.lt.u32.totalorder %s716_s19, %s819_s2  ;;  %p477_p2 = scmp.lt.u32.totalorder %s475_s26, %s470_s5 }
  0x36   : > { %p473_p8 = pnand %p471_p12, %p442_p1  ;;  %p479_p5 = scmp.lt.u32.totalorder %s470_s5, %s716_s19 }
  0x37   : > { %p478_p4 = por %p477_p2, %p476_p0 }
  0x38   : > { %p474_p10 = pneg %p473_p8 }
  0x39   : > { %p480_p7 = por %p479_p5, %p478_p4 }
  0x3b   : > { %p481_p9 = pnand %p480_p7, %p474_p10 }
  0x3d   : > { %484 = shalt.err (!%p481_p9)
}
  0x3e   : > { %s485_s29 = scalar_lea.vmem %s718_s11, 64  ;;  %s575_s4 = smov [#allocation7]  }
  0x3f   : > { %p486_p3 = scmp.ne.s32.totalorder %s718_s11, %s485_s29  ;;  %s490_s9 = sshll.u32 %s575_s4, 4  ;;  %s491_s9 = int_to_ptr.vmem [resolvable:$false] %s490_s9 }
  0x40   : > { %s492_s10 = scalar_lea.vmem %s491_s9, 128  ;;  %p493_p6 = scmp.lt.s32.totalorder %s718_s11, %s491_s9 }
  0x41   : > { %p488_p12 = pnand %p486_p3, %p442_p1  ;;  %p494_p0 = scmp.lt.s32.totalorder %s492_s10, %s485_s29 }
  0x43   : > { %p489_p8 = pneg %p488_p12  ;;  %p495_p2 = por %p494_p0, %p493_p6 }
  0x45   : > { %p496_p4 = pnand %p495_p2, %p489_p8 }
  0x47   : > { %499 = shalt.err (!%p496_p4)
}
  0x48   : > { %s576_s16 = smov 16   ;;  %s577_s18 = smov 1  }
  0x49   : > { %395 = dma.hbm_to_vmem [thread:$0]  (!%p671_p13), %s716_s19, 64, %s718_s11, %s141_s30, %s576_s16, %s576_s16, %s577_s18  }
  0x4a   : > { %163 = sbr.rel (%p708_p11) target bundleno = 113 (0x71), region = 28  ;;  %s749_s5 = sand.u32 (!%p708_p11), 1, %s562_s13  }
  0x4b   : > { %s368_s7 = sshll.u32 (!%p708_p11), %s749_s5, 3  ;;  %s166_s21 = scalar_lea.sflag (!%p708_p11), [#allocation5], %s749_s5 }
  0x4c   : > { %s169_s26 = scalar_lea.vmem (!%p708_p11), [#allocation4], %s368_s7  ;;  %p829_p6 = scmp.ne.s32.totalorder (!%p708_p11), %s824_s22, 0 }
  0x51   : > { %545 = dma.done.wait (%p829_p6), %s166_s21, 128  }
  0x52   : > { %547 = vsyncadd (%p829_p6), %s166_s21, 4294967168  ;;  %s369_s25 = sshll.u32 %s749_s5, 2  ;;  %s175_s6 = scalar_lea.sflag [#allocation8], %s749_s5 }
  0x53   : > { %s178_s8 = scalar_lea.vmem [#allocation7], %s369_s25 }
  0x54   : > { %549 = dma.done.wait (%p829_p6), %s175_s6, 64  }
  0x55   : > { %551 = vsyncadd (%p829_p6), %s175_s6, 4294967232  ;;  %vm243_vm0 = vcmask 254976   ;;  %s203_s11 = scalar_lea.vmem [#allocation9], %s368_s7  ;;  %s382_s30 = sshll.u32 %s622_s15, 7  ;;  %v371_v0 = vld [vmem:[%s178_s8] ss:$0 sm:$0xff] }
  0x56   : > { %s262_s19 = sshll.u32 %s203_s11, 4  ;;  %v211_v1 = vld [vmem:[%s169_s26] sm:$0x3]  ;;  %v372_v2 = vld [vmem:[%s178_s8 + $0x1] ss:$0 sm:$0xff]  ;;  %s769_s15 = scalar_lea.hbm %s820_s3, %s382_s30  ;;  %s764_s19 = int_to_ptr.vmem [resolvable:$true] %s262_s19 }
  0x57   : > { %v239_v3 = vadd.f32 %v371_v0, %v211_v1  ;;  %v212_v4 = vld [vmem:[%s169_s26 + $0x2] sm:$0x3]  ;;  %v373_v5 = vld [vmem:[%s178_s8 + $0x2] ss:$0 sm:$0xff]  ;;  %v213_v6 = vld [vmem:[%s169_s26 + $0x4] sm:$0x3] }
  0x58   : > { %v240_v7 = vadd.f32 %v372_v2, %v212_v4  ;;  %v241_v8 = vadd.f32 %v373_v5, %v213_v6  ;;  %v374_v9 = vld [vmem:[%s178_s8 + $0x3] ss:$0 sm:$0xff]  ;;  %v214_v10 = vld [vmem:[%s169_s26 + $0x6] sm:$0x3]  ;;  %s249_s28 = scalar_lea.sflag [#allocation6], %s749_s5  ;;  %s500_s29 = scalar_lea.vmem %s764_s19, 128 }
  0x59   : > { %244 = vst.msk [vmem:[%s203_s11] sm:$0x3] %vm243_vm0, %v239_v3  ;;  %v242_v11 = vadd.f32 %v374_v9, %v214_v10  ;;  %p501_p13 = scmp.ne.s32.totalorder %s764_s19, %s500_s29  ;;  %p830_p1 = scmp.ne.s32.totalorder %s825_s23, 0 }
  0x5a   : > { %245 = vst.msk [vmem:[%s203_s11 + $0x2] sm:$0x3] %vm243_vm0, %v240_v7  ;;  %246 = vst.msk [vmem:[%s203_s11 + $0x4] sm:$0x3] %vm243_vm0, %v241_v8  ;;  %s578_s4 = smov [#allocation9]  }
  0x5b   : > { %247 = vst.msk [vmem:[%s203_s11 + $0x6] sm:$0x3] %vm243_vm0, %v242_v11  ;;  %p502_p11 = pnand %p501_p13, %p830_p1  ;;  %s504_s9 = sshll.u32 %s578_s4, 4  ;;  %s505_s9 = int_to_ptr.vmem [resolvable:$false] %s504_s9 }
  0x5c   : > { %s506_s10 = scalar_lea.vmem %s505_s9, 256  ;;  %p507_p5 = scmp.lt.s32.totalorder %s764_s19, %s505_s9 }
  0x5d   : > { %p503_p10 = pneg %p502_p11  ;;  %p508_p7 = scmp.lt.s32.totalorder %s506_s10, %s500_s29 }
  0x5f   : > { %p509_p9 = por %p508_p7, %p507_p5 }
  0x61   : > { %p510_p3 = pnand %p509_p9, %p503_p10 }
  0x63   : > { %513 = shalt.err (!%p510_p3)
}
  0x64   : > { %s514_s16 = scalar_lea.hbm %s769_s15, 128  ;;  %s518_s21 = scalar_lea.hbm %s820_s3, 256 }
  0x65   : > { %p515_p12 = scmp.ne.s32.totalorder %s769_s15, %s514_s16  ;;  %p519_p2 = scmp.lt.u32.totalorder %s769_s15, %s820_s3 }
  0x66   : > { %p520_p4 = scmp.lt.u32.totalorder %s518_s21, %s514_s16  ;;  %p522_p13 = scmp.lt.u32.totalorder %s514_s16, %s769_s15 }
  0x67   : > { %p516_p8 = pnand %p515_p12, %p830_p1 }
  0x68   : > { %p521_p6 = por %p520_p4, %p519_p2 }
  0x69   : > { %p517_p0 = pneg %p516_p8 }
  0x6a   : > { %p523_p11 = por %p522_p13, %p521_p6 }
  0x6c   : > { %p524_p10 = pnand %p523_p11, %p517_p0 }
  0x6e   : > { %527 = shalt.err (!%p524_p10)
}
  0x6f   : > { %s579_s6 = smov 32   ;;  %s580_s8 = smov 2  }
  0x70   : > { %387 = dma.vmem_to_hbm [thread:$0]  (%p830_p1), %s764_s19, 128, %s769_s15, %s249_s28, %s579_s6, %s579_s6, %s580_s8  }
  0x71 PF: > { %s277_s11 = sand.u32 1, %s558_s12   ;;  %p831_p5 = scmp.ne.s32.totalorder %s826_s24, 0 }
  0x72   : > { %p832_p7 = scmp.ge.s32.totalorder %s570_s14, 2  ;;  %s278_s30 = scalar_lea.sflag [#allocation6], %s277_s11 }
  0x74   : > { %p397_p9 = pnand %p832_p7, %p831_p5 }
  0x76   : > { %553 = dma.done.wait (!%p397_p9), %s278_s30, 128  }
  0x77   : > { %555 = vsyncadd (!%p397_p9), %s278_s30, 4294967168  ;;  %p20_p3 = scmp.ge.s32.totalorder %s626_s17, 4   ;;  %s833_s12 = smov %s562_s13 }
  0x78   : > { %s834_s13 = smov %s566_s0  ;;  %s835_s0 = smov %s638_s20 }
  0x79   : > { %s836_s14 = smov %s626_s17  ;;  %22 = sbr.rel (!%p20_p3) target bundleno = 7 (0x7), region = 86 }
  0x80   :  { %283 = vsyncpa [#allocation5], 1 }
  0x81   :  { %285 = vsyncpa [#allocation5 + $0x1], 1 }
  0x82   :  { %286 = vsyncpa [#allocation8], 1 }
  0x83   :  { %288 = vsyncpa [#allocation8 + $0x1], 1 }
  0x84   :  { %289 = vsyncpa [#allocation6], 1 }
  0x85   :  { %291 = vsyncpa [#allocation6 + $0x1], 1 }

</bundles_post_ra>
